<compile_context>
chip_gen: v6e
topology: v6e:2x2x1
jax: 0.10.0
libtpu: 0.0.40
codegen_flags: <defaults>
</compile_context>

<pallas_src>
import functools

import jax
import jax.numpy as jnp
from jax.experimental import pallas as pl
from jax.experimental.pallas import tpu as pltpu


def residual_block_kernel(x_ref, mask_ref, w1_ref, w2_ref, o_ref, *, W):
    # x_ref   : (C, L)     f32, L = NB*H*W (NB whole images folded on lanes)
    # mask_ref: (9C+8, L)  f32 {0,1}; rows 0..9C-1 per-tap boundary masks (tap-major,
    #                      cin-minor), row 9C = ones (bias), rows 9C+1.. = 0 (K pad)
    # w*_ref  : (C, 9C+8)  bf16 BN-folded weights, cols (ky,kx,cin) then [bias | 0*7]
    # o_ref   : (C, L)     f32
    C, L = x_ref.shape
    x = x_ref[...]
    mask = mask_ref[...]
    w1 = w1_ref[...]
    w2 = w2_ref[...]
    ones_blk = jnp.ones((8, L), jnp.float32)   # rides the bias/padding mask rows

    def conv3x3(v, w):
        # v: (C, L) f32 -> 3x3 "same" conv (BN-folded weights + bias), as (C, L) f32.
        taps = []
        for dy in range(3):
            for dx in range(3):
                off = (dy - 1) * W + (dx - 1)
                if off == 0:
                    shifted = v
                else:
                    # shifted[t] = v[t + off]; wrap / cross-image lanes are masked out
                    shifted = pltpu.roll(v, (-off) % L, 1)
                taps.append(shifted)
        taps.append(ones_blk)
        s = (jnp.concatenate(taps, axis=0) * mask).astype(jnp.bfloat16)  # (9C+8, L)
        return jnp.dot(w, s, preferred_element_type=jnp.float32)         # one MXU pass

    y1 = jnp.maximum(conv3x3(x, w1), 0.0)                       # conv1 + bn1 + relu
    y2 = conv3x3(y1, w2)                                        # conv2 + bn2 (+bias)
    o_ref[...] = jnp.maximum(y2 + x, 0.0).astype(o_ref.dtype)   # + residual, relu


def _fold_bn(w, b, gamma, beta, mean, var, eps=1e-5):
    """Fold inference-mode BatchNorm2d into the preceding conv's weight/bias."""
    scale = gamma / jnp.sqrt(var + eps)                         # (C,)
    w_eff = w * scale[:, None, None, None]                      # (Cout, Cin, 3, 3)
    b_eff = (b - mean) * scale + beta                           # (Cout,)
    return w_eff, b_eff


def _conv_weight_matrix(w, b, C):
    """(Cout,Cin,ky,kx)+bias -> (Cout, 9*Cin + 8) bf16, tap-major/cin-minor + bias col."""
    w_mat = jnp.transpose(w, (0, 2, 3, 1)).reshape(C, 9 * C)
    pad = jnp.zeros((C, 7), w_mat.dtype)
    return jnp.concatenate([w_mat, b[:, None], pad], axis=1).astype(jnp.bfloat16)


def residual_block_forward(x, params, *, num_grid_steps=None):
    """x: (N, C, H, W) float32; params in PyTorch layout (OIHW conv weights)."""
    N, C, H, W = x.shape
    HW = H * W
    assert C % 8 == 0, "C must be a multiple of the f32 sublane tile (8)"
    assert HW % 128 == 0, "H*W must be a multiple of the 128-lane tile"

    if num_grid_steps is None:
        # >=2 steps keep both v7x TensorCores fed; a single extra step is ~0.35us on
        # single-TC v5e/v6e. Fold N/G whole images into the lane dimension per step.
        num_grid_steps = 2 if (N % 2 == 0 and N >= 2) else 1
    G = num_grid_steps
    assert N % G == 0
    NB = N // G
    L = NB * HW
    KP = 9 * C + 8

    w1, b1 = _fold_bn(params["w1"], params["b1"], params["g1"], params["beta1"],
                      params["m1"], params["v1"])
    w2, b2 = _fold_bn(params["w2"], params["b2"], params["g2"], params["beta2"],
                      params["m2"], params["v2"])
    w1_ext = _conv_weight_matrix(w1.astype(jnp.float32), b1.astype(jnp.float32), C)
    w2_ext = _conv_weight_matrix(w2.astype(jnp.float32), b2.astype(jnp.float32), C)

    # Hoisted per-tap boundary masks on the folded lane axis (lane t -> image t//HW,
    # pixel t%HW) plus the ones/zero rows that carry the bias through the matmul.
    t = jnp.arange(L, dtype=jnp.int32)
    p = t % HW
    row, col = p // W, p % W
    mask_rows = []
    for dy in range(3):
        for dx in range(3):
            valid = ((row + (dy - 1) >= 0) & (row + (dy - 1) < H) &
                     (col + (dx - 1) >= 0) & (col + (dx - 1) < W))
            mask_rows.append(valid)
    mask9 = jnp.stack(mask_rows, axis=0).astype(jnp.float32)          # (9, L)
    mask_full = jnp.concatenate([
        jnp.repeat(mask9, C, axis=0),                                 # (9C, L)
        jnp.ones((1, L), jnp.float32),                                # bias row
        jnp.zeros((7, L), jnp.float32),                               # K padding
    ], axis=0)                                                        # (KP, L)

    # NCHW -> (C, N*H*W): channels on sublanes, (image, pixel) flattened on lanes.
    x_folded = jnp.transpose(x.reshape(N, C, HW), (1, 0, 2)).reshape(C, N * HW)

    # VMEM guard: double-buffered in/out blocks + mask + weights + slab headroom must
    # stay under the 32 MiB default scoped limit (64 MiB physical on v7x).
    vmem_est = 2 * 2 * C * L * 4 + KP * L * 4 + 2 * C * KP * 2 + 3 * KP * L * 4
    assert vmem_est < 32 * 1024 * 1024, "re-tile HW (halo) or accumulate per tap"

    flops = 2 * 2 * C * KP * (N * HW)                 # two convs, MAC = 2 flops
    bytes_accessed = 2 * N * C * HW * 4 + KP * L * 4 + 2 * C * KP * 2

    out_folded = pl.pallas_call(
        functools.partial(residual_block_kernel, W=W),
        out_shape=jax.ShapeDtypeStruct((C, N * HW), x.dtype),
        grid_spec=pltpu.PrefetchScalarGridSpec(
            num_scalar_prefetch=0,
            grid=(G,),
            in_specs=[
                pl.BlockSpec((C, L), lambda g: (0, g)),
                pl.BlockSpec((KP, L), lambda g: (0, 0)),   # constant: fetched once
                pl.BlockSpec((C, KP), lambda g: (0, 0)),
                pl.BlockSpec((C, KP), lambda g: (0, 0)),
            ],
            out_specs=pl.BlockSpec((C, L), lambda g: (0, g)),
        ),
        compiler_params=pltpu.CompilerParams(
            dimension_semantics=("parallel",),
        ),
        cost_estimate=pl.CostEstimate(flops=flops, transcendentals=0,
                                      bytes_accessed=bytes_accessed),
    )(x_folded, mask_full, w1_ext, w2_ext)

    return jnp.transpose(out_folded.reshape(C, N, HW), (1, 0, 2)).reshape(N, C, H, W)


def residual_block_reference(x, params, eps=1e-5):
    """Pure-JAX reference (eval-mode BN), f32 at highest precision."""
    def conv(v, w, b):
        y = jax.lax.conv_general_dilated(
            v, w, window_strides=(1, 1), padding="SAME",
            dimension_numbers=("NCHW", "OIHW", "NCHW"),
            precision=jax.lax.Precision.HIGHEST)
        return y + b[None, :, None, None]

    def bn(v, gamma, beta, mean, var):
        inv = gamma / jnp.sqrt(var + eps)
        return (v - mean[None, :, None, None]) * inv[None, :, None, None] \
            + beta[None, :, None, None]

    out = jax.nn.relu(bn(conv(x, params["w1"], params["b1"]),
                         params["g1"], params["beta1"], params["m1"], params["v1"]))
    out = bn(conv(out, params["w2"], params["b2"]),
             params["g2"], params["beta2"], params["m2"], params["v2"])
    return jax.nn.relu(out + x)


if __name__ == "__main__":
    # Residual_Block(channel=8) on a small NCHW input: batch=2, channels=8, 16x16.
    N, C, H, W = 2, 8, 16, 16

    key = jax.random.PRNGKey(0)
    keys = jax.random.split(key, 12)
    x = jax.random.normal(keys[0], (N, C, H, W), dtype=jnp.float32)

    params = {
        "w1": jax.random.normal(keys[1], (C, C, 3, 3), jnp.float32) * 0.1,
        "b1": jax.random.normal(keys[2], (C,), jnp.float32) * 0.1,
        "g1": 1.0 + 0.1 * jax.random.normal(keys[3], (C,), jnp.float32),
        "beta1": 0.1 * jax.random.normal(keys[4], (C,), jnp.float32),
        "m1": 0.1 * jax.random.normal(keys[5], (C,), jnp.float32),
        "v1": 1.0 + 0.5 * jax.random.uniform(keys[6], (C,), jnp.float32),
        "w2": jax.random.normal(keys[7], (C, C, 3, 3), jnp.float32) * 0.1,
        "b2": jax.random.normal(keys[8], (C,), jnp.float32) * 0.1,
        "g2": 1.0 + 0.1 * jax.random.normal(keys[9], (C,), jnp.float32),
        "beta2": 0.1 * jax.random.normal(keys[10], (C,), jnp.float32),
        "m2": 0.1 * jax.random.normal(keys[11], (C,), jnp.float32),
        "v2": jnp.linspace(0.7, 1.3, C, dtype=jnp.float32),
    }

    out = residual_block_forward(x, params)
    out = jax.block_until_ready(out)

    ref = residual_block_reference(x, params)
    assert out.shape == (N, C, H, W)
    assert bool(jnp.all(jnp.isfinite(out)))
    # bf16 MXU operands (f32 accumulation) across two chained convs: error << 3e-2.
    assert bool(jnp.allclose(out, ref, atol=3e-2, rtol=3e-2)), \
        float(jnp.max(jnp.abs(out - ref)))

    print("KERNEL_OK")
</pallas_src>

<mosaic_0001>
module attributes {stable_mosaic.version = 11 : i64} {
  func.func @residual_block_kernel(%arg0: i32, %arg1: memref<8x256xf32, #tpu.memory_space<vmem>>, %arg2: memref<80x256xf32, #tpu.memory_space<vmem>>, %arg3: memref<8x80xbf16, #tpu.memory_space<vmem>>, %arg4: memref<8x80xbf16, #tpu.memory_space<vmem>>, %arg5: memref<8x256xf32, #tpu.memory_space<vmem>>) attributes {dimension_semantics = [#tpu.dimension_semantics<parallel>], iteration_bounds = array<i64: 2>, scalar_prefetch = 0 : i64, scratch_operands = 0 : i64, tpu.core_type = #tpu.core_type<tc>, window_params = [{transform_indices = @transform_0, window_bounds = array<i64: 8, 256>}, {pipeline_mode = #tpu.pipeline_mode<synchronous>, transform_indices = @transform_1, window_bounds = array<i64: 80, 256>}, {pipeline_mode = #tpu.pipeline_mode<synchronous>, transform_indices = @transform_2, window_bounds = array<i64: 8, 80>}, {pipeline_mode = #tpu.pipeline_mode<synchronous>, transform_indices = @transform_3, window_bounds = array<i64: 8, 80>}, {transform_indices = @transform_4, window_bounds = array<i64: 8, 256>}]} {
    %c0 = arith.constant 0 : index
    %c0_0 = arith.constant 0 : index
    %0 = vector.load %arg1[%c0, %c0_0] : memref<8x256xf32, #tpu.memory_space<vmem>>, vector<8x256xf32>
    %c0_1 = arith.constant 0 : index
    %c0_2 = arith.constant 0 : index
    %1 = vector.load %arg2[%c0_1, %c0_2] : memref<80x256xf32, #tpu.memory_space<vmem>>, vector<80x256xf32>
    %c0_3 = arith.constant 0 : index
    %c0_4 = arith.constant 0 : index
    %2 = vector.load %arg3[%c0_3, %c0_4] : memref<8x80xbf16, #tpu.memory_space<vmem>>, vector<8x80xbf16>
    %c0_5 = arith.constant 0 : index
    %c0_6 = arith.constant 0 : index
    %3 = vector.load %arg4[%c0_5, %c0_6] : memref<8x80xbf16, #tpu.memory_space<vmem>>, vector<8x80xbf16>
    %cst = arith.constant 1.000000e+00 : f32
    %4 = vector.broadcast %cst : f32 to vector<8x256xf32>
    %c17_i32 = arith.constant 17 : i32
    %5 = tpu.dynamic_rotate %0 by %c17_i32 dim 1 : vector<8x256xf32>, i32 -> vector<8x256xf32>
    %c16_i32 = arith.constant 16 : i32
    %6 = tpu.dynamic_rotate %0 by %c16_i32 dim 1 : vector<8x256xf32>, i32 -> vector<8x256xf32>
    %c15_i32 = arith.constant 15 : i32
    %7 = tpu.dynamic_rotate %0 by %c15_i32 dim 1 : vector<8x256xf32>, i32 -> vector<8x256xf32>
    %c1_i32 = arith.constant 1 : i32
    %8 = tpu.dynamic_rotate %0 by %c1_i32 dim 1 : vector<8x256xf32>, i32 -> vector<8x256xf32>
    %c255_i32 = arith.constant 255 : i32
    %9 = tpu.dynamic_rotate %0 by %c255_i32 dim 1 : vector<8x256xf32>, i32 -> vector<8x256xf32>
    %c241_i32 = arith.constant 241 : i32
    %10 = tpu.dynamic_rotate %0 by %c241_i32 dim 1 : vector<8x256xf32>, i32 -> vector<8x256xf32>
    %c240_i32 = arith.constant 240 : i32
    %11 = tpu.dynamic_rotate %0 by %c240_i32 dim 1 : vector<8x256xf32>, i32 -> vector<8x256xf32>
    %c239_i32 = arith.constant 239 : i32
    %12 = tpu.dynamic_rotate %0 by %c239_i32 dim 1 : vector<8x256xf32>, i32 -> vector<8x256xf32>
    %13 = tpu.concatenate %5, %6, %7, %8, %0, %9, %10, %11, %12, %4 in 0 : vector<8x256xf32>, vector<8x256xf32>, vector<8x256xf32>, vector<8x256xf32>, vector<8x256xf32>, vector<8x256xf32>, vector<8x256xf32>, vector<8x256xf32>, vector<8x256xf32>, vector<8x256xf32> -> vector<80x256xf32>
    %14 = arith.mulf %13, %1 : vector<80x256xf32>
    %15 = arith.truncf %14 : vector<80x256xf32> to vector<80x256xbf16>
    %cst_7 = arith.constant dense<0.000000e+00> : vector<8x256xf32>
    %16 = tpu.matmul %2, %15, %cst_7 {dimension_numbers = #tpu.dot_dimension_numbers<[1], [0], [0], [1], [0, 0, 1, 1], [], []>} : vector<8x80xbf16>, vector<80x256xbf16>, vector<8x256xf32> -> vector<8x256xf32>
    %cst_8 = arith.constant 0.000000e+00 : f32
    %17 = vector.broadcast %cst_8 : f32 to vector<8x256xf32>
    %18 = arith.maximumf %16, %17 : vector<8x256xf32>
    %c17_i32_9 = arith.constant 17 : i32
    %19 = tpu.dynamic_rotate %18 by %c17_i32_9 dim 1 : vector<8x256xf32>, i32 -> vector<8x256xf32>
    %c16_i32_10 = arith.constant 16 : i32
    %20 = tpu.dynamic_rotate %18 by %c16_i32_10 dim 1 : vector<8x256xf32>, i32 -> vector<8x256xf32>
    %c15_i32_11 = arith.constant 15 : i32
    %21 = tpu.dynamic_rotate %18 by %c15_i32_11 dim 1 : vector<8x256xf32>, i32 -> vector<8x256xf32>
    %c1_i32_12 = arith.constant 1 : i32
    %22 = tpu.dynamic_rotate %18 by %c1_i32_12 dim 1 : vector<8x256xf32>, i32 -> vector<8x256xf32>
    %c255_i32_13 = arith.constant 255 : i32
    %23 = tpu.dynamic_rotate %18 by %c255_i32_13 dim 1 : vector<8x256xf32>, i32 -> vector<8x256xf32>
    %c241_i32_14 = arith.constant 241 : i32
    %24 = tpu.dynamic_rotate %18 by %c241_i32_14 dim 1 : vector<8x256xf32>, i32 -> vector<8x256xf32>
    %c240_i32_15 = arith.constant 240 : i32
    %25 = tpu.dynamic_rotate %18 by %c240_i32_15 dim 1 : vector<8x256xf32>, i32 -> vector<8x256xf32>
    %c239_i32_16 = arith.constant 239 : i32
    %26 = tpu.dynamic_rotate %18 by %c239_i32_16 dim 1 : vector<8x256xf32>, i32 -> vector<8x256xf32>
    %27 = tpu.concatenate %19, %20, %21, %22, %18, %23, %24, %25, %26, %4 in 0 : vector<8x256xf32>, vector<8x256xf32>, vector<8x256xf32>, vector<8x256xf32>, vector<8x256xf32>, vector<8x256xf32>, vector<8x256xf32>, vector<8x256xf32>, vector<8x256xf32>, vector<8x256xf32> -> vector<80x256xf32>
    %28 = arith.mulf %27, %1 : vector<80x256xf32>
    %29 = arith.truncf %28 : vector<80x256xf32> to vector<80x256xbf16>
    %cst_17 = arith.constant dense<0.000000e+00> : vector<8x256xf32>
    %30 = tpu.matmul %3, %29, %cst_17 {dimension_numbers = #tpu.dot_dimension_numbers<[1], [0], [0], [1], [0, 0, 1, 1], [], []>} : vector<8x80xbf16>, vector<80x256xbf16>, vector<8x256xf32> -> vector<8x256xf32>
    %31 = arith.addf %30, %0 : vector<8x256xf32>
    %cst_18 = arith.constant 0.000000e+00 : f32
    %32 = vector.broadcast %cst_18 : f32 to vector<8x256xf32>
    %33 = arith.maximumf %31, %32 : vector<8x256xf32>
    %c0_19 = arith.constant 0 : index
    %c0_20 = arith.constant 0 : index
    %34 = vector.load %arg5[%c0_19, %c0_20] : memref<8x256xf32, #tpu.memory_space<vmem>>, vector<8x256xf32>
    tpu.vector_store %arg5[%c0_19, %c0_20], %33 {strides = array<i32>} : memref<8x256xf32, #tpu.memory_space<vmem>>, vector<8x256xf32>,
    return
  }
  func.func @transform_0(%arg0: i32) -> (i32, i32) {
    %c0_i32 = arith.constant 0 : i32
    %c0_i32_0 = arith.constant 0 : i32
    return %c0_i32, %arg0 : i32, i32
  }
  func.func @transform_1(%arg0: i32) -> (i32, i32) {
    %c0_i32 = arith.constant 0 : i32
    %c0_i32_0 = arith.constant 0 : i32
    %c0_i32_1 = arith.constant 0 : i32
    return %c0_i32, %c0_i32_0 : i32, i32
  }
  func.func @transform_2(%arg0: i32) -> (i32, i32) {
    %c0_i32 = arith.constant 0 : i32
    %c0_i32_0 = arith.constant 0 : i32
    %c0_i32_1 = arith.constant 0 : i32
    return %c0_i32, %c0_i32_0 : i32, i32
  }
  func.func @transform_3(%arg0: i32) -> (i32, i32) {
    %c0_i32 = arith.constant 0 : i32
    %c0_i32_0 = arith.constant 0 : i32
    %c0_i32_1 = arith.constant 0 : i32
    return %c0_i32, %c0_i32_0 : i32, i32
  }
  func.func @transform_4(%arg0: i32) -> (i32, i32) {
    %c0_i32 = arith.constant 0 : i32
    %c0_i32_0 = arith.constant 0 : i32
    return %c0_i32, %arg0 : i32, i32
  }
}

</mosaic_0001>

<bundles_post_ra>
// kernel: tpu_custom_call.1
= control target key start
LH: loop header
LB: loop body
LE: loop exit
PB: predicated region body
PF: predicated region fallthrough
CT: control target
= control target key end

     0   :  { %9 = vsyncpa [#allocation3], 0  ;;  %s1309_s0 = inlined_call_operand.hbm [shape: f32[8,512], index: 0, kind: input, shape index: {}]   ;;  %s1310_s1 = inlined_call_operand.hbm [shape: f32[80,256], index: 1, kind: input, shape index: {}]   ;;  %s1311_s2 = inlined_call_operand.hbm [shape: bf16[8,80], index: 2, kind: input, shape index: {}]   ;;  %s1312_s3 = inlined_call_operand.vmem [shape: bf16[8,80], index: 3, kind: input, shape index: {}]   ;;  %s1313_s4 = inlined_call_operand.hbm [shape: f32[8,512], index: 4, kind: output, shape index: {}]  }
   0x1   :  { %11 = vsyncpa [#allocation3 + $0x1], 0 }
   0x2   :  { %12 = vsyncpa [#allocation6], 0 }
   0x3   :  { %13 = vsyncpa [#allocation4], 0 }
   0x4   :  { %15 = vsyncpa [#allocation4 + $0x1], 0  ;;  %s919_s15 = smov 0   ;;  %s921_s16 = smov 0  }
   0x5   :  { %s923_s17 = smov 0   ;;  %s925_s18 = smov 0  }
   0x6 LB: > { %s940_s19 = sadd.s32 4294967295, %s877_s18   ;;  %s629_s20 = sadd.s32 4294967294, %s877_s18   ;;  %s877_s18 = sphi %s925_s18, %s1335_s18   ;;  %s873_s17 = sphi %s923_s17, %s1334_s17   ;;  %s869_s16 = sphi %s921_s16, %s1333_s16   ;;  %s865_s15 = sphi %s919_s15, %s1332_s15  }
   0x7   : > { %p41_p0 = scmp.ne.s32.totalorder %s869_s16, %s865_s15  ;;  %p1314_p1 = scmp.eq.s32.totalorder %s940_s19, 0 }
   0x8   : > { %p134_p3 = scmp.eq.s32.totalorder %s629_s20, 1  ;;  %p630_p5 = scmp.ge.s32.totalorder %s877_s18, 1 }
   0x9   : > { %p949_p4 = por %p1314_p1, %p41_p0  ;;  %p141_p7 = scmp.lt.s32.totalorder %s877_s18, 3 }
   0xa   : > { %p954_p6 = por %p134_p3, %p41_p0  ;;  %s879_s24 = smov [#allocation5]  }
   0xb   : > { %s1318_s21 = scalar_select %p949_p4, 1, 0 }
   0xc   : > { %s1319_s22 = scalar_select %p954_p6, 1, 0 }
   0xd   : > { %p959_p8 = pnand %p630_p5, %p141_p7  ;;  %s153_s25 = sshll.u32 %s879_s24, 4  ;;  %s154_s25 = int_to_ptr.vmem [resolvable:$true] %s153_s25 }
   0xe   : > { %s880_s27 = smov [#allocation7]   ;;  %s740_s29 = scalar_lea.vmem %s154_s25, 2560 }
   0xf   : > { %s1320_s23 = scalar_select %p959_p8, 1, 0 }
  0x10   : > { %p663_p9 = pneg %p959_p8  ;;  %s167_s28 = sshll.u32 %s880_s27, 4  ;;  %s168_s28 = int_to_ptr.vmem [resolvable:$true] %s167_s28 }
  0x11   : > { %p741_p13 = scmp.ne.s32.totalorder %s154_s25, %s740_s29  ;;  %p748_p5 = scmp.lt.s32.totalorder %s154_s25, %s154_s25 }
  0x12   : > { %p968_p11 = pnand %p663_p9, %p1314_p1  ;;  %p749_p7 = scmp.lt.s32.totalorder %s740_s29, %s740_s29 }
  0x14   : > { %p731_p12 = pneg %p968_p11  ;;  %p750_p10 = por %p749_p7, %p748_p5 }
  0x16   : > { %p743_p0 = pnand %p741_p13, %p731_p12 }
  0x18   : > { %p744_p3 = pneg %p743_p0 }
  0x1a   : > { %p751_p9 = pnand %p750_p10, %p744_p3 }
  0x1c   : > { %754 = shalt.err (!%p751_p9)
}
  0x1d   : > { %s881_s30 = smov 256   ;;  %s882_s5 = smov 16  }
  0x1e   : > { %666 = dma.hbm_to_vmem [thread:$0]  (!%p968_p11), %s1310_s1, 2560, %s154_s25, [#allocation6], %s881_s30, %s881_s30, %s882_s5  }
  0x1f   : > { %s766_s8 = scalar_lea.vmem %s168_s28, 64  ;;  %p774_p2 = scmp.lt.s32.totalorder %s168_s28, %s168_s28 }
  0x20   : > { %p767_p1 = scmp.ne.s32.totalorder %s168_s28, %s766_s8  ;;  %p775_p6 = scmp.lt.s32.totalorder %s766_s8, %s766_s8 }
  0x22   : > { %p769_p13 = pnand %p767_p1, %p731_p12  ;;  %p776_p5 = por %p775_p6, %p774_p2 }
  0x24   : > { %p770_p0 = pneg %p769_p13 }
  0x26   : > { %p777_p10 = pnand %p776_p5, %p770_p0 }
  0x28   : > { %780 = shalt.err (!%p777_p10)
}
  0x29   : > { %669 = dma.hbm_to_vmem [thread:$0]  (!%p968_p11), %s1311_s2, 64, %s168_s28, [#allocation6]  }
  0x2a   : > { %s991_s11 = sadd.s32 1, %s877_s18   ;;  %s28_s12 = sadd.s32 1, %s873_s17 }
  0x2b   : > { %s25_s13 = ssub.s32 %s877_s18, %s991_s11  ;;  %p35_p1 = scmp.ne.s32.totalorder %s873_s17, %s869_s16 }
  0x2c   : > { %p26_p2 = scmp.eq.s32.totalorder %s25_s13, 0  ;;  %p36_p6 = scmp.eq.s32.totalorder %s877_s18, 0 }
  0x2d   : > { %p1322_p12 = scmp.eq.s32.totalorder %s940_s19, 1  ;;  %p680_p7 = scmp.lt.s32.totalorder %s877_s18, 2 }
  0x2e   : > { %s1007_s20 = scalar_select %p26_p2, %s873_s17, %s28_s12  }
  0x2f   : > { %p1001_p3 = por %p1322_p12, %p35_p1  ;;  %p37_p9 = por %p36_p6, %p35_p1 }
  0x30   : > { %s181_s24 = sand.u32 1, %s873_s17   ;;  %s649_s26 = sshll.u32 %s877_s18, 8 }
  0x31   : > { %s1323_s14 = scalar_select %p1001_p3, 1, 0 }
  0x32   : > { %s634_s25 = sshll.u32 %s181_s24, 4  ;;  %s1014_s29 = scalar_lea.hbm %s1309_s0, %s649_s26 }
  0x33   : > { %s185_s30 = scalar_lea.vmem [#allocation2], %s634_s25  ;;  %p1016_p11 = pnand %p680_p7, %p37_p9 }
  0x34   : > { %s193_s5 = sshll.u32 %s185_s30, 4  ;;  %s182_s7 = scalar_lea.sflag [#allocation3], %s181_s24  ;;  %s194_s5 = int_to_ptr.vmem [resolvable:$true] %s193_s5 }
  0x35   : > { %s781_s8 = scalar_lea.hbm %s1014_s29, 256  ;;  %p783_p0 = pneg %p1016_p11 }
  0x36   : > { %p782_p13 = scmp.ne.s32.totalorder %s1014_s29, %s781_s8  ;;  %s786_s12 = scalar_lea.hbm %s1309_s0, 512 }
  0x37   : > { %p787_p1 = scmp.lt.s32.totalorder %s1014_s29, %s1309_s0  ;;  %p788_p2 = scmp.lt.s32.totalorder %s786_s12, %s781_s8 }
  0x38   : > { %p784_p5 = pnand %p783_p0, %p782_p13 }
  0x39   : > { %p789_p6 = por %p788_p2, %p787_p1 }
  0x3a   : > { %p785_p10 = pneg %p784_p5 }
  0x3c   : > { %p790_p12 = pnand %p789_p6, %p785_p10 }
  0x3e   : > { %793 = shalt.err (!%p790_p12)
}
  0x3f   : > { %s794_s26 = scalar_lea.vmem %s194_s5, 256  ;;  %s883_s24 = smov [#allocation2]  }
  0x40   : > { %p795_p7 = scmp.ne.s32.totalorder %s194_s5, %s794_s26  ;;  %s799_s27 = sshll.u32 %s883_s24, 4  ;;  %s800_s27 = int_to_ptr.vmem [resolvable:$false] %s799_s27 }
  0x41   : > { %s801_s28 = scalar_lea.vmem %s800_s27, 512  ;;  %p802_p13 = scmp.lt.s32.totalorder %s194_s5, %s800_s27 }
  0x42   : > { %p797_p9 = pnand %p795_p7, %p783_p0  ;;  %p803_p5 = scmp.lt.s32.totalorder %s801_s28, %s794_s26 }
  0x44   : > { %p798_p3 = pneg %p797_p9  ;;  %p804_p4 = por %p803_p5, %p802_p13 }
  0x46   : > { %p805_p8 = pnand %p804_p4, %p798_p3 }
  0x48   : > { %808 = shalt.err (!%p805_p8)
}
  0x49   : > { %673 = dma.hbm_to_vmem [thread:$0]  (!%p1016_p11), %s1014_s29, 256, %s194_s5, %s182_s7  }
  0x4a   : > { %p1325_p10 = scmp.ne.s32.totalorder %s1320_s23, 0 }
  0x4b   : > { %s1037_s30 = sand.u32 (!%p1325_p10), 1, %s869_s16   ;;  %p1326_p4 = scmp.ne.s32.totalorder (!%p1325_p10), %s1318_s21, 0 }
  0x4c   : > { %202 = sbr.rel (%p1325_p10) target bundleno = 799 (0x31f), region = 36  ;;  %s638_s8 = sshll.u32 (!%p1325_p10), %s1037_s30, 4 }
  0x4d   : > { %s205_s9 = scalar_lea.sflag (!%p1325_p10), [#allocation3], %s1037_s30  ;;  %s208_s10 = scalar_lea.vmem (!%p1325_p10), [#allocation2], %s638_s8 }
  0x51   : > { %852 = dma.done.wait (%p1326_p4), %s205_s9, 256  }
  0x52   : > { %854 = vsyncadd (%p1326_p4), %s205_s9, 4294967040  ;;  %p1327_p8 = scmp.eq.s32.totalorder %s940_s19, 0 }
  0x54   : > { %856 = dma.done.wait (%p1327_p8), [#allocation6], 2624   ;;  %p1328_p3 = pmov %p1327_p8 }
  0x55   : > { %v1051_v0 = vld [vmem:[%s208_s10] sm:$0xff]  ;;  %s884_s23 = smov 113   ;;  %s885_s29 = smov 111   ;;  %v1057_v1 = vld [vmem:[%s208_s10 + $0x8] sm:$0xff]  ;;  %v890_v2 = vmov 0   ;;  %v272_v3 = vlaneseq  ;;  %vm354_vm8 = vcmask 654336  }
  0x56   : > { %858 = vsyncadd (%p1328_p3), [#allocation6], 4294964672  ;;  %305 = vrot.lane.b32.xlu1 %v1051_v0, %s884_s23  ;;  %319 = vrot.lane.b32.xlu0 %v1051_v0, %s885_s29  ;;  %s886_s21 = smov 112   ;;  %s887_s5 = smov 127   ;;  %v1090_v7 = vld [vmem:[#allocation5 + $0x80] sm:$0xff]  ;;  %v1092_v8 = vld [vmem:[#allocation5 + $0x88] sm:$0xff] }
  0x57   : > { %s888_s6 = smov 15   ;;  %s889_s7 = smov 1   ;;  %390 = vmatprep.mubr.bf16.mxu0 %v890_v2  ;;  %512 = vmatprep.mubr.bf16.mxu1 %v890_v2  ;;  %v1087_v4 = vand.u32 127, %v272_v3  ;;  %v1099_v13 = vld [vmem:[#allocation5 + $0x98] sm:$0xff]  ;;  %v1101_v14 = vld [vmem:[#allocation5 + $0x90] sm:$0xff]  ;;  %v1103_v15 = vld [vmem:[#allocation5 + $0x60] sm:$0xff] }
  0x58   : > { %s891_s12 = smov 17   ;;  %s892_s13 = smov 16   ;;  %v1108_v18 = vld [vmem:[#allocation5 + $0x68] sm:$0xff]  ;;  %v1114_v21 = vld [vmem:[#allocation5 + $0x70] sm:$0xff]  ;;  %v1116_v22 = vld [vmem:[#allocation5 + $0x78] sm:$0xff] }
  0x59   : > { %vm323_vm0 = vcmp.lt.s32.totalorder %v1087_v4, 111  ;;  %vm309_vm1 = vcmp.lt.s32.totalorder %v1087_v4, 113  ;;  %vm316_vm2 = vcmp.lt.s32.totalorder %v1087_v4, 112  ;;  %vm302_vm3 = vcmp.lt.s32.totalorder %v1087_v4, 127  ;;  %v1125_v29 = vld [vmem:[#allocation5 + $0x48] sm:$0xff]  ;;  %v1127_v30 = vld [vmem:[#allocation5 + $0x40] sm:$0xff] }
  0x5a   : > { %307 = vrot.lane.b32.xlu1 %v1057_v1, %s884_s23  ;;  %321 = vrot.lane.b32.xlu0 %v1057_v1, %s885_s29  ;;  %v1133_v35 = vld [vmem:[#allocation5 + $0x50] sm:$0xff]  ;;  %v1135_v36 = vld [vmem:[#allocation5 + $0x58] sm:$0xff]  ;;  %v335_v41 = vmul.f32 %v1125_v29, %v1057_v1  ;;  %v334_v42 = vmul.f32 %v1127_v30, %v1051_v0  ;;  %vm288_vm4 = vcmp.lt.s32.totalorder %v1087_v4, 15  ;;  %v1148_v51 = vld [vmem:[#allocation5 + $0x20] sm:$0xff]  ;;  %vm295_vm5 = vcmp.lt.s32.totalorder %v1087_v4, 1  ;;  %s650_s24 = sshll.u32 %s940_s19, 8 }
  0x5b   : > { %v1151_v52 = vld [vmem:[#allocation5 + $0x28] sm:$0xff]  ;;  %v1157_v55 = vld [vmem:[#allocation5 + $0x30] sm:$0xff]  ;;  %v1159_v56 = vld [vmem:[#allocation5 + $0x38] sm:$0xff]  ;;  %vm274_vm6 = vcmp.lt.s32.totalorder %v1087_v4, 17  ;;  %vm281_vm7 = vcmp.lt.s32.totalorder %v1087_v4, 16  ;;  %s240_s27 = scalar_lea.vmem [#allocation8], %s638_s8 }
  0x5c   : > { %s540_s28 = sshll.u32 %s240_s27, 4  ;;  %p1329_p0 = scmp.ne.s32.totalorder %s1323_s14, 0  ;;  %s541_s28 = int_to_ptr.vmem [resolvable:$true] %s540_s28 }
  0x5d   : > { %s893_s19 = smov [#allocation8]  }
  0x5e   : > { %314 = vrot.lane.b32.xlu1 %v1057_v1, %s886_s21  ;;  %312 = vrot.lane.b32.xlu0 %v1051_v0, %s886_s21  ;;  %s813_s8 = sshll.u32 %s893_s19, 4  ;;  %s814_s8 = int_to_ptr.vmem [resolvable:$false] %s813_s8 }
  0x5f   : > { %p816_p6 = scmp.lt.s32.totalorder %s541_s28, %s814_s8 }
  0x62   : > { %300 = vrot.lane.b32.xlu1 %v1057_v1, %s887_s5  ;;  %298 = vrot.lane.b32.xlu0 %v1051_v0, %s887_s5 }
  0x66   : > { %286 = vrot.lane.b32.xlu1 %v1057_v1, %s888_s6  ;;  %284 = vrot.lane.b32.xlu0 %v1051_v0, %s888_s6 }
  0x6a   : > { %293 = vrot.lane.b32.xlu1 %v1057_v1, %s889_s7  ;;  %291 = vrot.lane.b32.xlu0 %v1051_v0, %s889_s7 }
  0x6e   : > { %270 = vrot.lane.b32.xlu1 %v1057_v1, %s891_s12  ;;  %268 = vrot.lane.b32.xlu0 %v1051_v0, %s891_s12 }
  0x72   : > { %279 = vrot.lane.b32.xlu1 %v1057_v1, %s892_s13  ;;  %277 = vrot.lane.b32.xlu0 %v1051_v0, %s892_s13 }
  0xc8   : > { %v306_v5 = vpop.permute.xlu1 %305  ;;  %v320_v6 = vpop.permute.xlu0 %319 }
  0xcc   : > { %v308_v9 = vpop.permute.xlu1 %307  ;;  %v322_v10 = vpop.permute.xlu0 %321 }
  0xcd   : > { %v324_v11 = vsel %vm323_vm0, %v320_v6, %v322_v10  ;;  %v325_v12 = vsel %vm323_vm0, %v322_v10, %v320_v6  ;;  %v310_v19 = vsel %vm309_vm1, %v306_v5, %v308_v9  ;;  %v311_v20 = vsel %vm309_vm1, %v308_v9, %v306_v5  ;;  %v1170_v10 = vld [vmem:[#allocation5] sm:$0xff] }
  0xce   : > { %v342_v16 = vmul.f32 %v324_v11, %v1090_v7  ;;  %v343_v17 = vmul.f32 %v325_v12, %v1092_v8  ;;  %v338_v31 = vmul.f32 %v310_v19, %v1103_v15  ;;  %v339_v32 = vmul.f32 %v311_v20, %v1108_v18  ;;  %v1173_v11 = vld [vmem:[#allocation5 + $0x8] sm:$0xff]  ;;  %v1181_v19 = vld [vmem:[#allocation5 + $0x18] sm:$0xff] }
  0xd0   : > { %v315_v23 = vpop.permute.xlu1 %314  ;;  %v313_v24 = vpop.permute.xlu0 %312  ;;  %v353_v25 = vpack.c.bf16 %v1099_v13, %v343_v17  ;;  %v352_v26 = vpack.c.bf16 %v1101_v14, %v342_v16  ;;  %v1179_v17 = vld [vmem:[#allocation5 + $0x10] sm:$0xff] }
  0xd1   : > { %v317_v27 = vsel %vm316_vm2, %v313_v24, %v315_v23  ;;  %v318_v28 = vsel %vm316_vm2, %v315_v23, %v313_v24 }
  0xd2   : > { %v340_v33 = vmul.f32 %v317_v27, %v1114_v21  ;;  %v341_v34 = vmul.f32 %v318_v28, %v1116_v22  ;;  %364 = vmatprep.subr.bf16.mxu0 %v353_v25 }
  0xd3   : > { %365 = vmatpush1.bf16.msra.mxu0 %v352_v26 }
  0xd4   : > { %v301_v37 = vpop.permute.xlu1 %300  ;;  %v299_v38 = vpop.permute.xlu0 %298  ;;  %v351_v39 = vpack.c.bf16 %v341_v34, %v339_v32  ;;  %v350_v40 = vpack.c.bf16 %v340_v33, %v338_v31  ;;  %v266_v34 = vld [vmem:[#allocation7] sm:$0xf] }
  0xd5   : > { %v303_v43 = vsel %vm302_vm3, %v299_v38, %v301_v37  ;;  %v304_v44 = vsel %vm302_vm3, %v301_v37, %v299_v38 }
  0xd6   : > { %v336_v45 = vmul.f32 %v303_v43, %v1133_v35  ;;  %v337_v46 = vmul.f32 %v304_v44, %v1135_v36  ;;  %366 = vmatprep.subr.bf16.mxu0 %v351_v39 }
  0xd7   : > { %367 = vmatpush1.bf16.msra.mxu0 %v350_v40 }
  0xd8   : > { %v287_v47 = vpop.permute.xlu1 %286  ;;  %v285_v48 = vpop.permute.xlu0 %284  ;;  %v349_v49 = vpack.c.bf16 %v337_v46, %v335_v41  ;;  %v348_v50 = vpack.c.bf16 %v336_v45, %v334_v42 }
  0xd9   : > { %v289_v53 = vsel %vm288_vm4, %v285_v48, %v287_v47  ;;  %v290_v54 = vsel %vm288_vm4, %v287_v47, %v285_v48 }
  0xda   : > { %368 = vmatprep.subr.bf16.mxu0 %v349_v49  ;;  %v330_v61 = vmul.f32 %v290_v54, %v1148_v51  ;;  %v331_v62 = vmul.f32 %v289_v53, %v1151_v52 }
  0xdb   : > { %369 = vmatpush1.bf16.msra.mxu0 %v348_v50 }
  0xdc   : > { %v294_v57 = vpop.permute.xlu1 %293  ;;  %v292_v58 = vpop.permute.xlu0 %291 }
  0xdd   : > { %v296_v59 = vsel %vm295_vm5, %v292_v58, %v294_v57  ;;  %v297_v60 = vsel %vm295_vm5, %v294_v57, %v292_v58 }
  0xde   : > { %v332_v63 = vmul.f32 %v297_v60, %v1157_v55  ;;  %v333_v2 = vmul.f32 %v296_v59, %v1159_v56 }
  0xe0   : > { %v271_v3 = vpop.permute.xlu1 %270  ;;  %v269_v5 = vpop.permute.xlu0 %268  ;;  %v347_v6 = vpack.c.bf16 %v333_v2, %v331_v62  ;;  %v346_v9 = vpack.c.bf16 %v332_v63, %v330_v61 }
  0xe1   : > { %v275_v12 = vsel %vm274_vm6, %v269_v5, %v271_v3  ;;  %v276_v16 = vsel %vm274_vm6, %v271_v3, %v269_v5 }
  0xe2   : > { %370 = vmatprep.subr.bf16.mxu0 %v347_v6  ;;  %v326_v26 = vmul.f32 %v276_v16, %v1170_v10  ;;  %v327_v27 = vmul.f32 %v275_v12, %v1173_v11 }
  0xe3   : > { %371 = vmatpush1.bf16.msra.mxu0 %v346_v9 }
  0xe4   : > { %v280_v20 = vpop.permute.xlu1 %279  ;;  %v278_v23 = vpop.permute.xlu0 %277 }
  0xe5   : > { %v282_v24 = vsel %vm281_vm7, %v278_v23, %v280_v20  ;;  %v283_v25 = vsel %vm281_vm7, %v280_v20, %v278_v23 }
  0xe6   : > { %v328_v28 = vmul.f32 %v283_v25, %v1179_v17  ;;  %v329_v31 = vmul.f32 %v282_v24, %v1181_v19 }
  0xe8   : > { %v345_v32 = vpack.c.bf16 %v329_v31, %v327_v27  ;;  %v344_v33 = vpack.c.bf16 %v328_v28, %v326_v26 }
  0xea   : > { %372 = vmatprep.subr.bf16.mxu0 %v345_v32 }
  0xeb   : > { %373 = vmatpush1.bf16.msra.mxu0 %v344_v33 }
  0xee   : > { %642 = vmatmul.mubr.msk.bf16.vlgmr.msra.gmra.mxu0 %vm354_vm8, %v266_v34 }
 0x1ae   : > { %v392_v37 = vpop.f32.mrf.mxu0 }
 0x1af   : > { %v399_v38 = vmax.f32 %v392_v37, 0.0 }
 0x1b0   : > { %v394_v39 = vpop.f32.mrf.mxu0 }
 0x1b1   : > { %v400_v40 = vmax.f32 %v394_v39, 0.0  ;;  %443 = vrot.lane.b32.xlu0 %v399_v38, %s885_s29 }
 0x1b2   : > { %v396_v41 = vpop.f32.mrf.mxu0 }
 0x1b3   : > { %445 = vrot.lane.b32.xlu1 %v400_v40, %s885_s29  ;;  %s526_s29 = scalar_lea.sflag [#allocation4], %s1037_s30 }
 0x1b4   : > { %v397_v42 = vpop.f32.mrf.mxu0 }
 0x1b5   : > { %431 = vrot.lane.b32.xlu0 %v399_v38, %s884_s23 }
 0x1b7   : > { %433 = vrot.lane.b32.xlu1 %v400_v40, %s884_s23  ;;  %s1272_s23 = scalar_lea.hbm %s1313_s4, %s650_s24 }
 0x1b9   : > { %437 = vrot.lane.b32.xlu0 %v399_v38, %s886_s21 }
 0x1bb   : > { %439 = vrot.lane.b32.xlu1 %v400_v40, %s886_s21  ;;  %s809_s21 = scalar_lea.vmem %s541_s28, 256 }
 0x1bc   : > { %p810_p11 = scmp.ne.s32.totalorder %s541_s28, %s809_s21 }
 0x1bd   : > { %425 = vrot.lane.b32.xlu0 %v399_v38, %s887_s5 }
 0x1be   : > { %p811_p1 = pnand %p810_p11, %p1329_p0 }
 0x1bf   : > { %427 = vrot.lane.b32.xlu1 %v400_v40, %s887_s5  ;;  %s815_s5 = scalar_lea.vmem %s814_s8, 512 }
 0x1c0   : > { %p812_p2 = pneg %p811_p1  ;;  %p817_p12 = scmp.lt.s32.totalorder %s815_s5, %s809_s21 }
 0x1c1   : > { %413 = vrot.lane.b32.xlu0 %v399_v38, %s888_s6 }
 0x1c2   : > { %p818_p7 = por %p817_p12, %p816_p6 }
 0x1c3   : > { %415 = vrot.lane.b32.xlu1 %v400_v40, %s888_s6 }
 0x1c4   : > { %p819_p9 = pnand %p818_p7, %p812_p2 }
 0x1c5   : > { %419 = vrot.lane.b32.xlu0 %v399_v38, %s889_s7 }
 0x1c7   : > { %421 = vrot.lane.b32.xlu1 %v400_v40, %s889_s7 }
 0x1c9   : > { %401 = vrot.lane.b32.xlu0 %v399_v38, %s891_s12 }
 0x1cb   : > { %403 = vrot.lane.b32.xlu1 %v400_v40, %s891_s12 }
 0x1cd   : > { %407 = vrot.lane.b32.xlu0 %v399_v38, %s892_s13 }
 0x1cf   : > { %409 = vrot.lane.b32.xlu1 %v400_v40, %s892_s13 }
 0x223   : > { %v444_v43 = vpop.permute.xlu0 %443 }
 0x225   : > { %v446_v44 = vpop.permute.xlu1 %445 }
 0x226   : > { %v447_v45 = vsel %vm323_vm0, %v444_v43, %v446_v44  ;;  %v448_v46 = vsel %vm323_vm0, %v446_v44, %v444_v43 }
 0x227   : > { %v465_v47 = vmul.f32 %v447_v45, %v1090_v7  ;;  %v432_v48 = vpop.permute.xlu0 %431  ;;  %v466_v49 = vmul.f32 %v448_v46, %v1092_v8  ;;  %v267_v46 = vld [vmem:[%s1312_s3] sm:$0xf] }
 0x229   : > { %v434_v50 = vpop.permute.xlu1 %433  ;;  %v476_v53 = vpack.c.bf16 %v1099_v13, %v466_v49  ;;  %v475_v54 = vpack.c.bf16 %v1101_v14, %v465_v47 }
 0x22a   : > { %v435_v58 = vsel %vm309_vm1, %v432_v48, %v434_v50  ;;  %v436_v59 = vsel %vm309_vm1, %v434_v50, %v432_v48 }
 0x22b   : > { %v438_v57 = vpop.permute.xlu0 %437  ;;  %486 = vmatprep.subr.bf16.mxu1 %v476_v53  ;;  %v461_v13 = vmul.f32 %v435_v58, %v1103_v15  ;;  %v462_v14 = vmul.f32 %v436_v59, %v1108_v18  ;;  %v458_v18 = vmul.f32 %v400_v40, %v1125_v29 }
 0x22c   : > { %487 = vmatpush1.bf16.msra.mxu1 %v475_v54 }
 0x22d   : > { %v440_v60 = vpop.permute.xlu1 %439 }
 0x22e   : > { %v441_v7 = vsel %vm316_vm2, %v438_v57, %v440_v60  ;;  %v442_v8 = vsel %vm316_vm2, %v440_v60, %v438_v57 }
 0x22f   : > { %v463_v61 = vmul.f32 %v441_v7, %v1114_v21  ;;  %v464_v62 = vmul.f32 %v442_v8, %v1116_v22  ;;  %v426_v63 = vpop.permute.xlu0 %425  ;;  %v457_v21 = vmul.f32 %v399_v38, %v1127_v30 }
 0x231   : > { %v428_v2 = vpop.permute.xlu1 %427  ;;  %v474_v3 = vpack.c.bf16 %v464_v62, %v462_v14  ;;  %v473_v5 = vpack.c.bf16 %v463_v61, %v461_v13 }
 0x232   : > { %v429_v6 = vsel %vm302_vm3, %v426_v63, %v428_v2  ;;  %v430_v9 = vsel %vm302_vm3, %v428_v2, %v426_v63 }
 0x233   : > { %v459_v12 = vmul.f32 %v429_v6, %v1133_v35  ;;  %v460_v15 = vmul.f32 %v430_v9, %v1135_v36  ;;  %v414_v16 = vpop.permute.xlu0 %413  ;;  %488 = vmatprep.subr.bf16.mxu1 %v474_v3 }
 0x234   : > { %489 = vmatpush1.bf16.msra.mxu1 %v473_v5 }
 0x235   : > { %v416_v22 = vpop.permute.xlu1 %415  ;;  %v472_v20 = vpack.c.bf16 %v460_v15, %v458_v18  ;;  %v471_v23 = vpack.c.bf16 %v459_v12, %v457_v21 }
 0x236   : > { %v417_v25 = vsel %vm288_vm4, %v414_v16, %v416_v22  ;;  %v418_v35 = vsel %vm288_vm4, %v416_v22, %v414_v16 }
 0x237   : > { %v420_v24 = vpop.permute.xlu0 %419  ;;  %490 = vmatprep.subr.bf16.mxu1 %v472_v20  ;;  %v453_v30 = vmul.f32 %v418_v35, %v1148_v51  ;;  %v454_v27 = vmul.f32 %v417_v25, %v1151_v52 }
 0x238   : > { %491 = vmatpush1.bf16.msra.mxu1 %v471_v23 }
 0x239   : > { %v422_v36 = vpop.permute.xlu1 %421 }
 0x23a   : > { %v423_v26 = vsel %vm295_vm5, %v420_v24, %v422_v36  ;;  %v424_v29 = vsel %vm295_vm5, %v422_v36, %v420_v24 }
 0x23b   : > { %v455_v28 = vmul.f32 %v424_v29, %v1157_v55  ;;  %v456_v31 = vmul.f32 %v423_v26, %v1159_v56  ;;  %v402_v32 = vpop.permute.xlu0 %401 }
 0x23d   : > { %v404_v33 = vpop.permute.xlu1 %403  ;;  %v470_v34 = vpack.c.bf16 %v456_v31, %v454_v27  ;;  %v469_v37 = vpack.c.bf16 %v455_v28, %v453_v30 }
 0x23e   : > { %v405_v38 = vsel %vm274_vm6, %v402_v32, %v404_v33  ;;  %v406_v39 = vsel %vm274_vm6, %v404_v33, %v402_v32 }
 0x23f   : > { %492 = vmatprep.subr.bf16.mxu1 %v470_v34  ;;  %v408_v40 = vpop.permute.xlu0 %407  ;;  %v449_v56 = vmul.f32 %v406_v39, %v1170_v10  ;;  %v450_v41 = vmul.f32 %v405_v38, %v1173_v11 }
 0x240   : > { %493 = vmatpush1.bf16.msra.mxu1 %v469_v37 }
 0x241   : > { %v410_v51 = vpop.permute.xlu1 %409 }
 0x242   : > { %v411_v52 = vsel %vm281_vm7, %v408_v40, %v410_v51  ;;  %v412_v55 = vsel %vm281_vm7, %v410_v51, %v408_v40 }
 0x243   : > { %v451_v42 = vmul.f32 %v412_v55, %v1179_v17  ;;  %v452_v43 = vmul.f32 %v411_v52, %v1181_v19 }
 0x245   : > { %v468_v44 = vpack.c.bf16 %v452_v43, %v450_v41  ;;  %v467_v45 = vpack.c.bf16 %v451_v42, %v449_v56 }
 0x247   : > { %494 = vmatprep.subr.bf16.mxu1 %v468_v44 }
 0x248   : > { %495 = vmatpush1.bf16.msra.mxu1 %v467_v45 }
 0x24b   : > { %643 = vmatmul.mubr.msk.bf16.vlgmr.msra.gmra.mxu1 %vm354_vm8, %v267_v46 }
 0x30b   : > { %v514_v4 = vpop.f32.mrf.mxu1 }
 0x30c   : > { %v515_v10 = vadd.f32 %v514_v4, %v1051_v0 }
 0x30d   : > { %v516_v47 = vpop.f32.mrf.mxu1 }
 0x30e   : > { %v521_v11 = vmax.f32 %v515_v10, 0.0  ;;  %v517_v17 = vadd.f32 %v516_v47, %v1057_v1 }
 0x30f   : > { %v518_v19 = vpop.f32.mrf.mxu1 }
 0x310   : > { %523 = vst [vmem:[%s240_s27] sm:$0xff] %v521_v11  ;;  %v522_v48 = vmax.f32 %v517_v17, 0.0 }
 0x311   : > { %v519_v49 = vpop.f32.mrf.mxu1 }
 0x312   : > { %524 = vst [vmem:[%s240_s27 + $0x8] sm:$0xff] %v522_v48 }
 0x313   : > { %822 = shalt.err (!%p819_p9)
}
 0x314   : > { %s823_s6 = scalar_lea.hbm %s1272_s23, 256  ;;  %s827_s12 = scalar_lea.hbm %s1313_s4, 512 }
 0x315   : > { %p824_p13 = scmp.ne.s32.totalorder %s1272_s23, %s823_s6  ;;  %p828_p4 = scmp.lt.s32.totalorder %s1272_s23, %s1313_s4 }
 0x316   : > { %p829_p8 = scmp.lt.s32.totalorder %s827_s12, %s823_s6 }
 0x317   : > { %p825_p5 = pnand %p824_p13, %p1329_p0 }
 0x318   : > { %p830_p3 = por %p829_p8, %p828_p4 }
 0x319   : > { %p826_p10 = pneg %p825_p5 }
 0x31b   : > { %p831_p11 = pnand %p830_p3, %p826_p10 }
 0x31d   : > { %834 = shalt.err (!%p831_p11)
}
 0x31e   : > { %661 = dma.vmem_to_hbm [thread:$0]  (%p1329_p0), %s541_s28, 256, %s1272_s23, %s526_s29  }
 0x31f PF: > { %s552_s26 = sand.u32 1, %s865_s15   ;;  %p1330_p1 = scmp.ne.s32.totalorder %s1319_s22, 0 }
 0x320   : > { %p1331_p2 = scmp.ge.s32.totalorder %s877_s18, 2  ;;  %s553_s24 = scalar_lea.sflag [#allocation4], %s552_s26 }
 0x322   : > { %p675_p6 = pnand %p1331_p2, %p1330_p1 }
 0x324   : > { %p676_p12 = pneg %p675_p6 }
 0x326   : > { %860 = dma.done.wait (%p676_p12), %s553_s24, 256  }
 0x327   : > { %862 = vsyncadd (%p676_p12), %s553_s24, 4294967040  ;;  %p18_p7 = scmp.ge.s32.totalorder %s991_s11, 4   ;;  %s1332_s15 = smov %s869_s16 }
 0x328   : > { %s1333_s16 = smov %s873_s17  ;;  %s1334_s17 = smov %s1007_s20 }
 0x329   : > { %s1335_s18 = smov %s991_s11  ;;  %20 = sbr.rel (!%p18_p7) target bundleno = 6 (0x6), region = 89 }
 0x32e   :  { %558 = vsyncpa [#allocation3], 1 }
 0x32f   :  { %560 = vsyncpa [#allocation3 + $0x1], 1 }
 0x330   :  { %561 = vsyncpa [#allocation6], 1 }
 0x331   :  { %562 = vsyncpa [#allocation4], 1 }
 0x332   :  { %564 = vsyncpa [#allocation4 + $0x1], 1 }

</bundles_post_ra>
